<compile_context>
chip_gen: v7x
topology: tpu7x:2x2x1
jax: 0.10.0
libtpu: 0.0.40
codegen_flags: <defaults>
</compile_context>

<pallas_src>
import functools

import jax
import jax.numpy as jnp
from jax.experimental import pallas as pl
from jax.experimental.pallas import tpu as pltpu

N_IN = 28 * 28          # 784 (multiple of 8 -> sublane-legal contraction dim)
HID_PAD = 128           # 64/128-wide hidden layers padded to 128 lanes
N_CLASSES = 10
N_OUT_PAD = 128         # fc4 matmul output padded to 128 lanes (lane-dense MXU)
NEG_BIG = -1.0e30       # bias for padded logit columns -> exp() == 0 in f32


def _round_up(x, m):
    return (x + m - 1) // m * m


def mlp_kernel(x_ref, w1_ref, b1_ref, w2_ref, b2_ref,
               w3_ref, b3_ref, w4_ref, b4_ref, out_ref):
    # Cast the streamed tile to bf16 right before the MXU (in-kernel, no extra
    # HBM pass in the wrapper).
    x = x_ref[...].astype(jnp.bfloat16)
    # fc1 + relu  (bf16 matmul, f32 accumulate / elementwise; K = 784 unpadded)
    h = jnp.dot(x, w1_ref[...], preferred_element_type=jnp.float32)
    h = jnp.maximum(h + b1_ref[...], 0.0)
    # fc2 + relu
    h = jnp.dot(h.astype(jnp.bfloat16), w2_ref[...],
                preferred_element_type=jnp.float32)
    h = jnp.maximum(h + b2_ref[...], 0.0)
    # fc3 + relu
    h = jnp.dot(h.astype(jnp.bfloat16), w3_ref[...],
                preferred_element_type=jnp.float32)
    h = jnp.maximum(h + b3_ref[...], 0.0)
    # fc4 (logits); padded output columns carry bias -1e30 -> vanish in softmax
    logits = jnp.dot(h.astype(jnp.bfloat16), w4_ref[...],
                     preferred_element_type=jnp.float32)
    logits = logits + b4_ref[...]
    # log_softmax along lanes (lane-dense XLU reduce + EUP exp/log)
    m = jnp.max(logits, axis=-1, keepdims=True)
    z = logits - m
    lse = jnp.log(jnp.sum(jnp.exp(z), axis=-1, keepdims=True))
    # Store only the 10 real classes (tiny masked store; 40 B/row writeback).
    out_ref[...] = (z - lse)[:, :N_CLASSES]


def init_params(key):
    """PyTorch nn.Linear default init (U[-1/sqrt(fan_in), +]), logical shapes.

    Weights are stored transposed vs PyTorch, i.e. (in_features, out_features).
    """
    dims = [(N_IN, 64), (64, 128), (128, 64), (64, N_CLASSES)]
    params = []
    for fan_in, fan_out in dims:
        kw, kb, key = jax.random.split(key, 3)
        bound = 1.0 / jnp.sqrt(float(fan_in))
        w = jax.random.uniform(kw, (fan_in, fan_out), jnp.float32, -bound, bound)
        b = jax.random.uniform(kb, (1, fan_out), jnp.float32, -bound, bound)
        params += [w, b]
    return tuple(params)


def prepare_params(params):
    """Pad layer widths to 128 lanes (K of fc1 stays 784); weights -> bf16."""
    w1, b1, w2, b2, w3, b3, w4, b4 = params

    def pad_w(w, rows, cols):
        out = jnp.zeros((rows, cols), jnp.float32)
        out = out.at[:w.shape[0], :w.shape[1]].set(w)
        return out.astype(jnp.bfloat16)

    def pad_b(b, cols, fill=0.0):
        out = jnp.full((1, cols), fill, jnp.float32)
        return out.at[:, :b.shape[1]].set(b)

    return (
        pad_w(w1, N_IN, HID_PAD),      pad_b(b1, HID_PAD),
        pad_w(w2, HID_PAD, HID_PAD),   pad_b(b2, HID_PAD),
        pad_w(w3, HID_PAD, HID_PAD),   pad_b(b3, HID_PAD),
        pad_w(w4, HID_PAD, N_OUT_PAD), pad_b(b4, N_OUT_PAD, fill=NEG_BIG),
    )


@functools.partial(jax.jit, static_argnames=("tm",))
def mlp_forward(x, prepared, tm=1024):
    w1, b1, w2, b2, w3, b3, w4, b4 = prepared
    B = x.shape[0]
    # Batch tile: multiple of 8 sublanes, capped at ceil(B/2) so the grid keeps
    # >=2 tiles when possible (both v7x TensorCores busy), and at `tm` so the
    # per-step VMEM footprint stays comfortably inside the scoped limit.
    half = _round_up(pl.cdiv(B, 2), 8)
    TM = max(8, min(tm, half))
    grid = (pl.cdiv(B, TM),)  # ragged last tile: reads padded, stores masked

    const2 = lambda i: (0, 0)  # weights/biases: constant index map, VMEM-resident
    out = pl.pallas_call(
        mlp_kernel,
        out_shape=jax.ShapeDtypeStruct((B, N_CLASSES), jnp.float32),
        grid=grid,
        in_specs=[
            pl.BlockSpec((TM, N_IN), lambda i: (i, 0)),  # x streamed as-is
            pl.BlockSpec(w1.shape, const2),
            pl.BlockSpec(b1.shape, const2),
            pl.BlockSpec(w2.shape, const2),
            pl.BlockSpec(b2.shape, const2),
            pl.BlockSpec(w3.shape, const2),
            pl.BlockSpec(b3.shape, const2),
            pl.BlockSpec(w4.shape, const2),
            pl.BlockSpec(b4.shape, const2),
        ],
        out_specs=pl.BlockSpec((TM, N_CLASSES), lambda i: (i, 0)),
        compiler_params=pltpu.CompilerParams(
            dimension_semantics=("parallel",),      # batch tiles shard across TCs
            vmem_limit_bytes=32 * 1024 * 1024),     # headroom for big tiles on v5e
    )(x, w1, b1, w2, b2, w3, b3, w4, b4)
    return out


def reference_forward(x, prepared):
    """Pure-JAX mirror of the kernel math (same bf16 matmul boundaries)."""
    w1, b1, w2, b2, w3, b3, w4, b4 = prepared
    h = jnp.dot(x.astype(jnp.bfloat16), w1,
                preferred_element_type=jnp.float32) + b1
    h = jnp.maximum(h, 0.0)
    h = jnp.dot(h.astype(jnp.bfloat16), w2,
                preferred_element_type=jnp.float32) + b2
    h = jnp.maximum(h, 0.0)
    h = jnp.dot(h.astype(jnp.bfloat16), w3,
                preferred_element_type=jnp.float32) + b3
    h = jnp.maximum(h, 0.0)
    logits = jnp.dot(h.astype(jnp.bfloat16), w4,
                     preferred_element_type=jnp.float32) + b4
    m = jnp.max(logits, axis=-1, keepdims=True)
    z = logits - m
    lse = jnp.log(jnp.sum(jnp.exp(z), axis=-1, keepdims=True))
    return (z - lse)[:, :N_CLASSES]


if __name__ == "__main__":
    key = jax.random.PRNGKey(0)
    kx, kp = jax.random.split(key)
    B = 8
    x = jax.random.normal(kx, (B, N_IN), jnp.float32)
    params = init_params(kp)
    prepared = prepare_params(params)

    out = mlp_forward(x, prepared)
    out = jax.block_until_ready(out)

    ref = reference_forward(x, prepared)
    assert out.shape == (B, N_CLASSES)
    assert jnp.allclose(out, ref, atol=1e-3, rtol=1e-3), "mismatch vs reference"
    # log_softmax rows must sum to ~1 in probability space
    assert jnp.allclose(jnp.sum(jnp.exp(out), axis=-1), 1.0, atol=1e-3)
    print("KERNEL_OK")
</pallas_src>

<mosaic_0001>
module attributes {stable_mosaic.version = 11 : i64} {
  func.func @mlp_kernel(%arg0: i32, %arg1: memref<8x784xf32, #tpu.memory_space<vmem>>, %arg2: memref<784x128xbf16, #tpu.memory_space<vmem>>, %arg3: memref<1x128xf32, #tpu.memory_space<vmem>>, %arg4: memref<128x128xbf16, #tpu.memory_space<vmem>>, %arg5: memref<1x128xf32, #tpu.memory_space<vmem>>, %arg6: memref<128x128xbf16, #tpu.memory_space<vmem>>, %arg7: memref<1x128xf32, #tpu.memory_space<vmem>>, %arg8: memref<128x128xbf16, #tpu.memory_space<vmem>>, %arg9: memref<1x128xf32, #tpu.memory_space<vmem>>, %arg10: memref<8x10xf32, #tpu.memory_space<vmem>>) attributes {dimension_semantics = [#tpu.dimension_semantics<parallel>], iteration_bounds = array<i64: 1>, scalar_prefetch = 0 : i64, scratch_operands = 0 : i64, tpu.core_type = #tpu.core_type<tc>, window_params = [{transform_indices = @transform_0, window_bounds = array<i64: 8, 784>}, {pipeline_mode = #tpu.pipeline_mode<synchronous>, transform_indices = @transform_1, window_bounds = array<i64: 784, 128>}, {pipeline_mode = #tpu.pipeline_mode<synchronous>, transform_indices = @transform_2, window_bounds = array<i64: 1, 128>}, {pipeline_mode = #tpu.pipeline_mode<synchronous>, transform_indices = @transform_3, window_bounds = array<i64: 128, 128>}, {pipeline_mode = #tpu.pipeline_mode<synchronous>, transform_indices = @transform_4, window_bounds = array<i64: 1, 128>}, {pipeline_mode = #tpu.pipeline_mode<synchronous>, transform_indices = @transform_5, window_bounds = array<i64: 128, 128>}, {pipeline_mode = #tpu.pipeline_mode<synchronous>, transform_indices = @transform_6, window_bounds = array<i64: 1, 128>}, {pipeline_mode = #tpu.pipeline_mode<synchronous>, transform_indices = @transform_7, window_bounds = array<i64: 128, 128>}, {pipeline_mode = #tpu.pipeline_mode<synchronous>, transform_indices = @transform_8, window_bounds = array<i64: 1, 128>}, {transform_indices = @transform_9, window_bounds = array<i64: 8, 10>}]} {
    %c0 = arith.constant 0 : index
    %c0_0 = arith.constant 0 : index
    %0 = vector.load %arg1[%c0, %c0_0] : memref<8x784xf32, #tpu.memory_space<vmem>>, vector<8x784xf32>
    %1 = arith.truncf %0 : vector<8x784xf32> to vector<8x784xbf16>
    %c0_1 = arith.constant 0 : index
    %c0_2 = arith.constant 0 : index
    %2 = vector.load %arg2[%c0_1, %c0_2] : memref<784x128xbf16, #tpu.memory_space<vmem>>, vector<784x128xbf16>
    %cst = arith.constant dense<0.000000e+00> : vector<8x128xf32>
    %3 = tpu.matmul %1, %2, %cst {dimension_numbers = #tpu.dot_dimension_numbers<[1], [0], [0], [1], [0, 0, 1, 1], [], []>} : vector<8x784xbf16>, vector<784x128xbf16>, vector<8x128xf32> -> vector<8x128xf32>
    %c0_3 = arith.constant 0 : index
    %c0_4 = arith.constant 0 : index
    %4 = vector.load %arg3[%c0_3, %c0_4] : memref<1x128xf32, #tpu.memory_space<vmem>>, vector<1x128xf32>
    %5 = vector.broadcast %4 : vector<1x128xf32> to vector<8x128xf32>
    %6 = arith.addf %3, %5 : vector<8x128xf32>
    %cst_5 = arith.constant 0.000000e+00 : f32
    %7 = vector.broadcast %cst_5 : f32 to vector<8x128xf32>
    %8 = arith.maximumf %6, %7 : vector<8x128xf32>
    %9 = arith.truncf %8 : vector<8x128xf32> to vector<8x128xbf16>
    %c0_6 = arith.constant 0 : index
    %c0_7 = arith.constant 0 : index
    %10 = vector.load %arg4[%c0_6, %c0_7] : memref<128x128xbf16, #tpu.memory_space<vmem>>, vector<128x128xbf16>
    %cst_8 = arith.constant dense<0.000000e+00> : vector<8x128xf32>
    %11 = tpu.matmul %9, %10, %cst_8 {dimension_numbers = #tpu.dot_dimension_numbers<[1], [0], [0], [1], [0, 0, 1, 1], [], []>} : vector<8x128xbf16>, vector<128x128xbf16>, vector<8x128xf32> -> vector<8x128xf32>
    %c0_9 = arith.constant 0 : index
    %c0_10 = arith.constant 0 : index
    %12 = vector.load %arg5[%c0_9, %c0_10] : memref<1x128xf32, #tpu.memory_space<vmem>>, vector<1x128xf32>
    %13 = vector.broadcast %12 : vector<1x128xf32> to vector<8x128xf32>
    %14 = arith.addf %11, %13 : vector<8x128xf32>
    %cst_11 = arith.constant 0.000000e+00 : f32
    %15 = vector.broadcast %cst_11 : f32 to vector<8x128xf32>
    %16 = arith.maximumf %14, %15 : vector<8x128xf32>
    %17 = arith.truncf %16 : vector<8x128xf32> to vector<8x128xbf16>
    %c0_12 = arith.constant 0 : index
    %c0_13 = arith.constant 0 : index
    %18 = vector.load %arg6[%c0_12, %c0_13] : memref<128x128xbf16, #tpu.memory_space<vmem>>, vector<128x128xbf16>
    %cst_14 = arith.constant dense<0.000000e+00> : vector<8x128xf32>
    %19 = tpu.matmul %17, %18, %cst_14 {dimension_numbers = #tpu.dot_dimension_numbers<[1], [0], [0], [1], [0, 0, 1, 1], [], []>} : vector<8x128xbf16>, vector<128x128xbf16>, vector<8x128xf32> -> vector<8x128xf32>
    %c0_15 = arith.constant 0 : index
    %c0_16 = arith.constant 0 : index
    %20 = vector.load %arg7[%c0_15, %c0_16] : memref<1x128xf32, #tpu.memory_space<vmem>>, vector<1x128xf32>
    %21 = vector.broadcast %20 : vector<1x128xf32> to vector<8x128xf32>
    %22 = arith.addf %19, %21 : vector<8x128xf32>
    %cst_17 = arith.constant 0.000000e+00 : f32
    %23 = vector.broadcast %cst_17 : f32 to vector<8x128xf32>
    %24 = arith.maximumf %22, %23 : vector<8x128xf32>
    %25 = arith.truncf %24 : vector<8x128xf32> to vector<8x128xbf16>
    %c0_18 = arith.constant 0 : index
    %c0_19 = arith.constant 0 : index
    %26 = vector.load %arg8[%c0_18, %c0_19] : memref<128x128xbf16, #tpu.memory_space<vmem>>, vector<128x128xbf16>
    %cst_20 = arith.constant dense<0.000000e+00> : vector<8x128xf32>
    %27 = tpu.matmul %25, %26, %cst_20 {dimension_numbers = #tpu.dot_dimension_numbers<[1], [0], [0], [1], [0, 0, 1, 1], [], []>} : vector<8x128xbf16>, vector<128x128xbf16>, vector<8x128xf32> -> vector<8x128xf32>
    %c0_21 = arith.constant 0 : index
    %c0_22 = arith.constant 0 : index
    %28 = vector.load %arg9[%c0_21, %c0_22] : memref<1x128xf32, #tpu.memory_space<vmem>>, vector<1x128xf32>
    %29 = vector.broadcast %28 : vector<1x128xf32> to vector<8x128xf32>
    %30 = arith.addf %27, %29 : vector<8x128xf32>
    %cst_23 = arith.constant dense<0xFF800000> : vector<8xf32>
    %31 = vector.multi_reduction <maximumf>, %30, %cst_23 [1] : vector<8x128xf32> to vector<8xf32>
    %32 = vector.shape_cast %31 : vector<8xf32> to vector<8x1xf32>
    %33 = vector.broadcast %32 : vector<8x1xf32> to vector<8x128xf32>
    %34 = arith.subf %30, %33 : vector<8x128xf32>
    %35 = math.exp %34 : vector<8x128xf32>
    %cst_24 = arith.constant dense<0.000000e+00> : vector<8xf32>
    %36 = vector.multi_reduction <add>, %35, %cst_24 [1] : vector<8x128xf32> to vector<8xf32>
    %37 = vector.shape_cast %36 : vector<8xf32> to vector<8x1xf32>
    %38 = math.log %37 : vector<8x1xf32>
    %39 = vector.broadcast %38 : vector<8x1xf32> to vector<8x128xf32>
    %40 = arith.subf %34, %39 : vector<8x128xf32>
    %41 = vector.extract_strided_slice %40 {offsets = [0, 0], sizes = [8, 10], strides = [1, 1]} : vector<8x128xf32> to vector<8x10xf32>
    %c0_25 = arith.constant 0 : index
    %c0_26 = arith.constant 0 : index
    %42 = vector.load %arg10[%c0_25, %c0_26] : memref<8x10xf32, #tpu.memory_space<vmem>>, vector<8x10xf32>
    tpu.vector_store %arg10[%c0_25, %c0_26], %41 {strides = array<i32>} : memref<8x10xf32, #tpu.memory_space<vmem>>, vector<8x10xf32>,
    return
  }
  func.func @transform_0(%arg0: i32) -> (i32, i32) {
    %c0_i32 = arith.constant 0 : i32
    %c0_i32_0 = arith.constant 0 : i32
    return %arg0, %c0_i32 : i32, i32
  }
  func.func @transform_1(%arg0: i32) -> (i32, i32) {
    %c0_i32 = arith.constant 0 : i32
    %c0_i32_0 = arith.constant 0 : i32
    %c0_i32_1 = arith.constant 0 : i32
    return %c0_i32, %c0_i32_0 : i32, i32
  }
  func.func @transform_2(%arg0: i32) -> (i32, i32) {
    %c0_i32 = arith.constant 0 : i32
    %c0_i32_0 = arith.constant 0 : i32
    %c0_i32_1 = arith.constant 0 : i32
    return %c0_i32, %c0_i32_0 : i32, i32
  }
  func.func @transform_3(%arg0: i32) -> (i32, i32) {
    %c0_i32 = arith.constant 0 : i32
    %c0_i32_0 = arith.constant 0 : i32
    %c0_i32_1 = arith.constant 0 : i32
    return %c0_i32, %c0_i32_0 : i32, i32
  }
  func.func @transform_4(%arg0: i32) -> (i32, i32) {
    %c0_i32 = arith.constant 0 : i32
    %c0_i32_0 = arith.constant 0 : i32
    %c0_i32_1 = arith.constant 0 : i32
    return %c0_i32, %c0_i32_0 : i32, i32
  }
  func.func @transform_5(%arg0: i32) -> (i32, i32) {
    %c0_i32 = arith.constant 0 : i32
    %c0_i32_0 = arith.constant 0 : i32
    %c0_i32_1 = arith.constant 0 : i32
    return %c0_i32, %c0_i32_0 : i32, i32
  }
  func.func @transform_6(%arg0: i32) -> (i32, i32) {
    %c0_i32 = arith.constant 0 : i32
    %c0_i32_0 = arith.constant 0 : i32
    %c0_i32_1 = arith.constant 0 : i32
    return %c0_i32, %c0_i32_0 : i32, i32
  }
  func.func @transform_7(%arg0: i32) -> (i32, i32) {
    %c0_i32 = arith.constant 0 : i32
    %c0_i32_0 = arith.constant 0 : i32
    %c0_i32_1 = arith.constant 0 : i32
    return %c0_i32, %c0_i32_0 : i32, i32
  }
  func.func @transform_8(%arg0: i32) -> (i32, i32) {
    %c0_i32 = arith.constant 0 : i32
    %c0_i32_0 = arith.constant 0 : i32
    %c0_i32_1 = arith.constant 0 : i32
    return %c0_i32, %c0_i32_0 : i32, i32
  }
  func.func @transform_9(%arg0: i32) -> (i32, i32) {
    %c0_i32 = arith.constant 0 : i32
    %c0_i32_0 = arith.constant 0 : i32
    return %arg0, %c0_i32 : i32, i32
  }
}

</mosaic_0001>

<bundles_post_ra>
// kernel: mlp_forward.1
= control target key start
LH: loop header
LB: loop body
LE: loop exit
PB: predicated region body
PF: predicated region fallthrough
CT: control target
= control target key end

     0   :  { %14 = vsyncpa [#allocation3], 0  ;;  %s1700_s0 = inlined_call_operand.hbm [shape: f32[8,784], index: 0, kind: input, shape index: {}]   ;;  %s1701_s1 = inlined_call_operand.hbm [shape: bf16[784,128], index: 1, kind: input, shape index: {}]   ;;  %s1702_s2 = inlined_call_operand.vmem [shape: f32[1,128], index: 2, kind: input, shape index: {}]   ;;  %s1703_s3 = inlined_call_operand.hbm [shape: bf16[128,128], index: 3, kind: input, shape index: {}]   ;;  %s1704_s4 = inlined_call_operand.vmem [shape: f32[1,128], index: 4, kind: input, shape index: {}]   ;;  %s1705_s5 = inlined_call_operand.hbm [shape: bf16[128,128], index: 5, kind: input, shape index: {}]   ;;  %s1706_s6 = inlined_call_operand.vmem [shape: f32[1,128], index: 6, kind: input, shape index: {}]   ;;  %s1707_s7 = inlined_call_operand.hbm [shape: bf16[128,128], index: 7, kind: input, shape index: {}]   ;;  %s1708_s8 = inlined_call_operand.vmem [shape: f32[1,128], index: 8, kind: input, shape index: {}]   ;;  %s1709_s9 = inlined_call_operand.hbm [shape: f32[8,10], index: 9, kind: output, shape index: {}]  }
   0x1   :  { %15 = vsyncpa [#allocation6], 0 }
   0x2   :  { %16 = vsyncpa [#allocation9], 0 }
   0x3   :  { %17 = vsyncpa [#allocation4], 0  ;;  %s1511_s30 = smov [#allocation5]   ;;  %s1371_s13 = scalar_lea.hbm %s1701_s1, 6272 }
   0x4   :  { %s33_s10 = sshll.u32 %s1511_s30, 4  ;;  %p1372_p0 = scmp.ne.s32.totalorder %s1701_s1, %s1371_s13  ;;  %s34_s10 = int_to_ptr.vmem [resolvable:$true] %s33_s10 }
   0x5   :  { %p1375_p1 = scmp.lt.u32.totalorder %s1371_s13, %s1701_s1 }
   0x7   :  { %p1377_p2 = pnand %p1375_p1, %p1372_p0 }
   0x9   :  { %1380 = shalt.err (!%p1377_p2)
}
   0xa   :  { %s1381_s18 = scalar_lea.vmem %s34_s10, 6272  ;;  %p1386_p4 = scmp.lt.s32.totalorder %s34_s10, %s34_s10 }
   0xb   :  { %p1382_p3 = scmp.ne.s32.totalorder %s34_s10, %s1381_s18  ;;  %p1387_p5 = scmp.lt.s32.totalorder %s1381_s18, %s1381_s18 }
   0xd   :  { %p1388_p6 = por %p1387_p5, %p1386_p4 }
   0xf   :  { %p1389_p7 = pnand %p1388_p6, %p1382_p3 }
  0x11   :  { %1392 = shalt.err (!%p1389_p7)
}
  0x12   :  { %s1512_s19 = smov 64   ;;  %s1513_s20 = smov 4  }
  0x13   :  { %39 = dma.hbm_to_vmem [thread:$0]  %s1701_s1, 6272, %s34_s10, [#allocation6], %s1512_s19, %s1512_s19, %s1513_s20  }
  0x14   :  { %s1514_s23 = smov [#allocation8]   ;;  %s1515_s25 = smov [#allocation2]  }
  0x15   :  { %s61_s24 = sshll.u32 %s1514_s23, 4  ;;  %s24_s26 = sshll.u32 %s1515_s25, 4  ;;  %s62_s24 = int_to_ptr.vmem [resolvable:$true] %s61_s24  ;;  %s25_s26 = int_to_ptr.vmem [resolvable:$true] %s24_s26 }
  0x16   :  { %s1393_s29 = scalar_lea.hbm %s1705_s5, 1024 }
  0x17   :  { %p1394_p8 = scmp.ne.s32.totalorder %s1705_s5, %s1393_s29  ;;  %p1397_p9 = scmp.lt.u32.totalorder %s1393_s29, %s1705_s5 }
  0x19   :  { %p1399_p10 = pnand %p1397_p9, %p1394_p8 }
  0x1b   :  { %1402 = shalt.err (!%p1399_p10)
}
  0x1c   :  { %s1403_s1 = scalar_lea.vmem %s62_s24, 1024  ;;  %p1408_p12 = scmp.lt.s32.totalorder %s62_s24, %s62_s24 }
  0x1d   :  { %p1404_p11 = scmp.ne.s32.totalorder %s62_s24, %s1403_s1  ;;  %p1409_p13 = scmp.lt.s32.totalorder %s1403_s1, %s1403_s1 }
  0x1f   :  { %p1410_p0 = por %p1409_p13, %p1408_p12 }
  0x21   :  { %p1411_p1 = pnand %p1410_p0, %p1404_p11 }
  0x23   :  { %1414 = shalt.err (!%p1411_p1)
}
  0x24   :  { %67 = dma.hbm_to_vmem [thread:$0]  %s1705_s5, 1024, %s62_s24, [#allocation9], %s1512_s19, %s1512_s19, %s1513_s20  }
  0x25   :  { %s1415_s17 = scalar_lea.hbm %s1700_s0, 896 }
  0x26   :  { %p1416_p2 = scmp.ne.s32.totalorder %s1700_s0, %s1415_s17  ;;  %p1419_p3 = scmp.lt.u32.totalorder %s1415_s17, %s1700_s0 }
  0x28   :  { %p1421_p4 = pnand %p1419_p3, %p1416_p2 }
  0x2a   :  { %1424 = shalt.err (!%p1421_p4)
}
  0x2b   :  { %s1425_s25 = scalar_lea.vmem %s25_s26, 896  ;;  %p1430_p6 = scmp.lt.s32.totalorder %s25_s26, %s25_s26 }
  0x2c   :  { %p1426_p5 = scmp.ne.s32.totalorder %s25_s26, %s1425_s25  ;;  %p1431_p7 = scmp.lt.s32.totalorder %s1425_s25, %s1425_s25 }
  0x2e   :  { %p1432_p8 = por %p1431_p7, %p1430_p6 }
  0x30   :  { %p1433_p9 = pnand %p1432_p8, %p1426_p5 }
  0x32   :  { %1436 = shalt.err (!%p1433_p9)
}
  0x33   :  { %27 = dma.hbm_to_vmem [thread:$0]  %s1700_s0, 896, %s25_s26, [#allocation3]  }
  0x34   :  { %s1516_s27 = smov [#allocation7]   ;;  %s1517_s29 = smov [#allocation10]  }
  0x35   :  { %s47_s28 = sshll.u32 %s1516_s27, 4  ;;  %s75_s30 = sshll.u32 %s1517_s29, 4  ;;  %s48_s28 = int_to_ptr.vmem [resolvable:$true] %s47_s28  ;;  %s76_s30 = int_to_ptr.vmem [resolvable:$true] %s75_s30 }
  0x36   :  { %s1437_s13 = scalar_lea.hbm %s1703_s3, 1024 }
  0x37   :  { %p1438_p10 = scmp.ne.s32.totalorder %s1703_s3, %s1437_s13  ;;  %p1441_p11 = scmp.lt.u32.totalorder %s1437_s13, %s1703_s3 }
  0x39   :  { %p1443_p12 = pnand %p1441_p11, %p1438_p10 }
  0x3b   :  { %1446 = shalt.err (!%p1443_p12)
}
  0x3c   :  { %s1447_s0 = scalar_lea.vmem %s48_s28, 1024  ;;  %p1452_p0 = scmp.lt.s32.totalorder %s48_s28, %s48_s28 }
  0x3d   :  { %p1448_p13 = scmp.ne.s32.totalorder %s48_s28, %s1447_s0  ;;  %p1453_p1 = scmp.lt.s32.totalorder %s1447_s0, %s1447_s0 }
  0x3f   :  { %p1454_p2 = por %p1453_p1, %p1452_p0 }
  0x41   :  { %p1455_p3 = pnand %p1454_p2, %p1448_p13 }
  0x43   :  { %1458 = shalt.err (!%p1455_p3)
}
  0x44   :  { %53 = dma.hbm_to_vmem [thread:$0]  %s1703_s3, 1024, %s48_s28, [#allocation6], %s1512_s19, %s1512_s19, %s1513_s20  }
  0x45   :  { %s1459_s21 = scalar_lea.hbm %s1707_s7, 1024 }
  0x46   :  { %p1460_p4 = scmp.ne.s32.totalorder %s1707_s7, %s1459_s21  ;;  %p1463_p5 = scmp.lt.u32.totalorder %s1459_s21, %s1707_s7 }
  0x48   :  { %p1465_p6 = pnand %p1463_p5, %p1460_p4 }
  0x4a   :  { %1468 = shalt.err (!%p1465_p6)
}
  0x4b   :  { %s1469_s24 = scalar_lea.vmem %s76_s30, 1024  ;;  %p1474_p8 = scmp.lt.s32.totalorder %s76_s30, %s76_s30 }
  0x4c   :  { %p1470_p7 = scmp.ne.s32.totalorder %s76_s30, %s1469_s24  ;;  %p1475_p9 = scmp.lt.s32.totalorder %s1469_s24, %s1469_s24 }
  0x4e   :  { %p1476_p10 = por %p1475_p9, %p1474_p8 }
  0x50   :  { %p1477_p11 = pnand %p1476_p10, %p1470_p7 }
  0x52   :  { %1480 = shalt.err (!%p1477_p11)
}
  0x53   :  { %81 = dma.hbm_to_vmem [thread:$0]  %s1707_s7, 1024, %s76_s30, [#allocation9], %s1512_s19, %s1512_s19, %s1513_s20  }
  0x54   :  { %1503 = dma.done.wait [#allocation3], 896  }
  0x55   :  { %1504 = vsyncadd [#allocation3], 4294966400 }
  0x56   :  { %1505 = dma.done.wait [#allocation6], 7296  }
  0x57   :  { %1506 = vsyncadd [#allocation6], 4294960000 }
  0x58   :  { %1507 = dma.done.wait [#allocation9], 2048  }
  0x59   :  { %1508 = vsyncadd [#allocation9], 4294965248  ;;  %v1294_v0 = vld [vmem:[#allocation5 + $0x40] sm:$0xff]   ;;  %v1298_v4 = vld [vmem:[#allocation5 + $0x48] sm:$0xff]   ;;  %v1518_v44 = vmov 0.0   ;;  %vm1519_vm0 = vmmov 0  }
  0x5a   :  { %v1295_v1 = vld [vmem:[#allocation5] sm:$0xff]   ;;  %1123 = vmatprep.subr.bf16.mxu0 %v1294_v0  ;;  %v1299_v5 = vld [vmem:[#allocation5 + $0x8] sm:$0xff]   ;;  %v1302_v8 = vld [vmem:[#allocation5 + $0x50] sm:$0xff]   ;;  %vm513_vm1 = vcmask 130048   ;;  %vm1026_vm2 = vcmask 80896  }
  0x5b   :  { %v1296_v2 = vld [vmem:[#allocation5 + $0xc0] sm:$0xff]   ;;  %1124 = vmatpush3.bf16.msra.mxu0 %v1295_v1  ;;  %v1300_v6 = vld [vmem:[#allocation5 + $0xc8] sm:$0xff]   ;;  %v1303_v9 = vld [vmem:[#allocation5 + $0x10] sm:$0xff]  }
  0x5c   :  { %v1297_v3 = vld [vmem:[#allocation5 + $0x80] sm:$0xff]   ;;  %1145 = vmatprep.subr.bf16.mxu1 %v1296_v2  ;;  %1125 = vmatprep.subr.bf16.mxu0 %v1298_v4  ;;  %v1301_v7 = vld [vmem:[#allocation5 + $0x88] sm:$0xff]   ;;  %v1304_v10 = vld [vmem:[#allocation5 + $0xd0] sm:$0xff]  }
  0x5d   :  { %1146 = vmatpush3.bf16.msra.mxu1 %v1297_v3  ;;  %v1305_v11 = vld [vmem:[#allocation5 + $0x90] sm:$0xff]   ;;  %v1306_v12 = vld [vmem:[#allocation5 + $0x58] sm:$0xff]   ;;  %v1310_v16 = vld [vmem:[#allocation5 + $0x60] sm:$0xff]  }
  0x5e   :  { %1147 = vmatprep.subr.bf16.mxu1 %v1300_v6  ;;  %v1307_v13 = vld [vmem:[#allocation5 + $0x18] sm:$0xff]   ;;  %v1311_v17 = vld [vmem:[#allocation5 + $0x20] sm:$0xff]   ;;  %v1314_v20 = vld [vmem:[#allocation5 + $0x68] sm:$0xff]  }
  0x5f   :  { %1126 = vmatpush3.bf16.msra.mxu0 %v1299_v5  ;;  %v1308_v14 = vld [vmem:[#allocation5 + $0xd8] sm:$0xff]   ;;  %v1312_v18 = vld [vmem:[#allocation5 + $0xe0] sm:$0xff]   ;;  %v1315_v21 = vld [vmem:[#allocation5 + $0x28] sm:$0xff]  }
  0x60   :  { %1127 = vmatprep.subr.bf16.mxu0 %v1302_v8  ;;  %v1309_v15 = vld [vmem:[#allocation5 + $0x98] sm:$0xff]   ;;  %v1313_v19 = vld [vmem:[#allocation5 + $0xa0] sm:$0xff]   ;;  %v1316_v22 = vld [vmem:[#allocation5 + $0xe8] sm:$0xff]  }
  0x61   :  { %1148 = vmatpush3.bf16.msra.mxu1 %v1301_v7  ;;  %v1317_v23 = vld [vmem:[#allocation5 + $0xa8] sm:$0xff]   ;;  %v1318_v24 = vld [vmem:[#allocation5 + $0x70] sm:$0xff]   ;;  %v1322_v28 = vld [vmem:[#allocation5 + $0x78] sm:$0xff]  }
  0x62   :  { %1149 = vmatprep.subr.bf16.mxu1 %v1304_v10  ;;  %v1319_v25 = vld [vmem:[#allocation5 + $0x30] sm:$0xff]   ;;  %v1323_v29 = vld [vmem:[#allocation5 + $0x38] sm:$0xff]   ;;  %v100_v34 = vld [vmem:[#allocation2] sm:$0xff] }
  0x63   :  { %1128 = vmatpush3.bf16.msra.mxu0 %v1303_v9  ;;  %v1320_v26 = vld [vmem:[#allocation5 + $0xf0] sm:$0xff]   ;;  %v1324_v30 = vld [vmem:[#allocation5 + $0xf8] sm:$0xff]   ;;  %v107_v35 = vpack.c.bf16 %v100_v34, %v100_v34  ;;  %v1326_v36 = vld [vmem:[#allocation5 + $0x140] sm:$0xff]  }
  0x64   :  { %1129 = vmatprep.subr.bf16.mxu0 %v1306_v12  ;;  %v1321_v27 = vld [vmem:[#allocation5 + $0xb0] sm:$0xff]   ;;  %v1325_v33 = vld [vmem:[#allocation5 + $0xb8] sm:$0xff]   ;;  %v103_v37 = vld [vmem:[#allocation2 + $0x18] sm:$0xff] }
  0x65   :  { %1150 = vmatpush3.bf16.msra.mxu1 %v1305_v11  ;;  %v101_v31 = vld [vmem:[#allocation2 + $0x8] sm:$0xff]  ;;  %v110_v38 = vpack.c.bf16 %v103_v37, %v103_v37  ;;  %v1327_v39 = vld [vmem:[#allocation5 + $0x100] sm:$0xff]   ;;  %v102_v40 = vld [vmem:[#allocation2 + $0x10] sm:$0xff] }
  0x66   :  { %1151 = vmatprep.subr.bf16.mxu1 %v1308_v14  ;;  %v108_v32 = vpack.c.bf16 %v101_v31, %v101_v31  ;;  %v109_v41 = vpack.c.bf16 %v102_v40, %v102_v40  ;;  %v1328_v42 = vld [vmem:[#allocation5 + $0x148] sm:$0xff]   ;;  %v1330_v45 = vld [vmem:[#allocation5 + $0x150] sm:$0xff]   ;;  %v1332_v47 = vld [vmem:[#allocation5 + $0x158] sm:$0xff]  }
  0x67   :  { %1130 = vmatpush3.bf16.msra.mxu0 %v1307_v13  ;;  %589 = vmatprep.mubr.bf16.mxu1 %v110_v38  ;;  %v1329_v43 = vld [vmem:[#allocation5 + $0x108] sm:$0xff]   ;;  %v1331_v46 = vld [vmem:[#allocation5 + $0x110] sm:$0xff]   ;;  %v1333_v48 = vld [vmem:[#allocation5 + $0x118] sm:$0xff]  }
  0x68   :  { %1131 = vmatprep.subr.bf16.mxu0 %v1310_v16  ;;  %549 = vmatprep.mubr.bf16.mxu0 %v108_v32  ;;  %v1334_v49 = vld [vmem:[#allocation5 + $0x160] sm:$0xff]   ;;  %v1336_v51 = vld [vmem:[#allocation5 + $0x168] sm:$0xff]   ;;  %v105_v54 = vld [vmem:[#allocation2 + $0x28] sm:$0xff] }
  0x69   :  { %1152 = vmatpush3.bf16.msra.mxu1 %v1309_v15  ;;  %v1335_v50 = vld [vmem:[#allocation5 + $0x120] sm:$0xff]   ;;  %v1337_v52 = vld [vmem:[#allocation5 + $0x128] sm:$0xff]   ;;  %v1338_v55 = vld [vmem:[#allocation5 + $0x170] sm:$0xff]   ;;  %v112_v56 = vpack.c.bf16 %v105_v54, %v105_v54 }
  0x6a   :  { %1153 = vmatprep.subr.bf16.mxu1 %v1312_v18  ;;  %v1342_v53 = vld [vmem:[#allocation5 + $0x180] sm:$0xff]   ;;  %v106_v57 = vld [vmem:[#allocation2 + $0x30] sm:$0xff]  ;;  %v1339_v59 = vld [vmem:[#allocation5 + $0x130] sm:$0xff]  }
  0x6b   :  { %1132 = vmatpush3.bf16.msra.mxu0 %v1311_v17  ;;  %v113_v58 = vpack.c.bf16 %v106_v57, %v106_v57  ;;  %v1340_v60 = vld [vmem:[#allocation5 + $0x178] sm:$0xff]   ;;  %v104_v62 = vld [vmem:[#allocation2 + $0x20] sm:$0xff]  ;;  %v1344_v1 = vld [vmem:[#allocation7 + $0x8] sm:$0xff]  }
  0x6c   :  { %1133 = vmatprep.subr.bf16.mxu0 %v1314_v20  ;;  %v1341_v61 = vld [vmem:[#allocation5 + $0x138] sm:$0xff]   ;;  %v111_v63 = vpack.c.bf16 %v104_v62, %v104_v62  ;;  %v1343_v0 = vld [vmem:[#allocation7] sm:$0xff]   ;;  %v1346_v3 = vld [vmem:[#allocation7 + $0x18] sm:$0xff]  }
  0x6d   :  { %1154 = vmatpush3.bf16.msra.mxu1 %v1313_v19  ;;  %v1345_v2 = vld [vmem:[#allocation7 + $0x10] sm:$0xff]   ;;  %v1347_v4 = vld [vmem:[#allocation7 + $0x20] sm:$0xff]   ;;  %v1348_v5 = vld [vmem:[#allocation7 + $0x28] sm:$0xff]  }
  0x6e   :  { %1155 = vmatprep.subr.bf16.mxu1 %v1316_v22  ;;  %v1349_v6 = vld [vmem:[#allocation7 + $0x30] sm:$0xff]   ;;  %v1350_v7 = vld [vmem:[#allocation7 + $0x38] sm:$0xff]   ;;  %v1351_v8 = vld [vmem:[#allocation8] sm:$0xff]  }
  0x6f   :  { %1134 = vmatpush3.bf16.msra.mxu0 %v1315_v21  ;;  %v1352_v9 = vld [vmem:[#allocation8 + $0x8] sm:$0xff]   ;;  %v1353_v10 = vld [vmem:[#allocation8 + $0x10] sm:$0xff]   ;;  %v1354_v11 = vld [vmem:[#allocation8 + $0x18] sm:$0xff]  }
  0x70   :  { %1135 = vmatprep.subr.bf16.mxu0 %v1318_v24  ;;  %v1355_v12 = vld [vmem:[#allocation8 + $0x20] sm:$0xff]   ;;  %v1356_v13 = vld [vmem:[#allocation8 + $0x28] sm:$0xff]   ;;  %v1357_v40 = vld [vmem:[#allocation8 + $0x30] sm:$0xff]  }
  0x71   :  { %1156 = vmatpush3.bf16.msra.mxu1 %v1317_v23  ;;  %v1045_v15 = vld [vmem:[%s1702_s2] ss:$0 sm:$0xff]  ;;  %v1365_v57 = vld [vmem:[#allocation10 + $0x30] sm:$0xff]  }
  0x72   :  { %1157 = vmatprep.subr.bf16.mxu1 %v1320_v26 }
  0x73   :  { %1136 = vmatpush3.bf16.msra.mxu0 %v1319_v25 }
  0x74   :  { %1137 = vmatprep.subr.bf16.mxu0 %v1322_v28 }
  0x75   :  { %1158 = vmatpush3.bf16.msra.mxu1 %v1321_v27 }
  0x76   :  { %1159 = vmatprep.subr.bf16.mxu1 %v1324_v30 }
  0x77   :  { %1138 = vmatpush3.bf16.msra.mxu0 %v1323_v29 }
  0x78   :  { %1167 = vmatprep.subr.bf16.mxu0 %v1326_v36 }
  0x79   :  { %1160 = vmatpush3.bf16.msra.mxu1 %v1325_v33 }
  0x7a   :  { %550 = vmatmul.mubr.bf16.vlgmr.msra.gmra.mrb[0].mxu0 %v107_v35  ;;  %1218 = vmatprep.subr.bf16.mxu1 %v1518_v44 }
  0x7b   :  { %1168 = vmatpush3.bf16.msra.mxu0 %v1327_v39  ;;  %629 = vmatprep.mubr.bf16.mxu0 %v112_v56 }
  0x7c   :  { %590 = vmatmul.mubr.bf16.vlgmr.msra.gmra.mrb[0].mxu1 %v109_v41  ;;  %1169 = vmatprep.subr.bf16.mxu0 %v1328_v42  ;;  %v1358_v41 = vld [vmem:[#allocation8 + $0x38] sm:$0xff]   ;;  %v1359_v42 = vld [vmem:[#allocation10] sm:$0xff]  }
  0x7d   :  { %1220 = vmatprep.mubr.msk.bf16.mxu1 %vm1519_vm0, %v1518_v44  ;;  %1219 = vmatpush3.bf16.msra.mxu1 %v1342_v53 }
  0x7e   :  { %1224 = vmatprep.subr.bf16.mxu1 %v1518_v44 }
  0x7f   :  { %1170 = vmatpush3.bf16.msra.mxu0 %v1329_v43  ;;  %v1360_v43 = vld [vmem:[#allocation10 + $0x8] sm:$0xff]  }
  0x80   :  { %1171 = vmatprep.subr.bf16.mxu0 %v1330_v45  ;;  %v1361_v45 = vld [vmem:[#allocation10 + $0x10] sm:$0xff]  }
  0x83   :  { %1172 = vmatpush3.bf16.msra.mxu0 %v1331_v46  ;;  %v1362_v46 = vld [vmem:[#allocation10 + $0x18] sm:$0xff]  }
  0x84   :  { %1173 = vmatprep.subr.bf16.mxu0 %v1332_v47  ;;  %1221 = vmatmul.mubr.msk.bf16.vlgmr.msra.gmra.mrb[4].mxu1 %vm513_vm1, %v113_v58  ;;  %v1363_v47 = vld [vmem:[#allocation10 + $0x20] sm:$0xff]   ;;  %v1366_v58 = vld [vmem:[#allocation10 + $0x38] sm:$0xff]  }
  0x85   :  { %1240 = vmatprep.mubr.msk.bf16.mxu1 %vm1519_vm0, %v1518_v44  ;;  %1225 = vmatpush3.bf16.msra.mxu1 %v1343_v0 }
  0x86   :  { %1226 = vmatprep.subr.bf16.mxu1 %v1518_v44 }
  0x87   :  { %1174 = vmatpush3.bf16.msra.mxu0 %v1333_v48  ;;  %v1364_v48 = vld [vmem:[#allocation10 + $0x28] sm:$0xff]  }
  0x88   :  { %1175 = vmatprep.subr.bf16.mxu0 %v1334_v49  ;;  %v1096_v49 = vld [vmem:[%s1704_s4] ss:$0 sm:$0xff] }
  0x89   :  { %1227 = vmatpush3.bf16.msra.mxu1 %v1344_v1 }
  0x8a   :  { %1228 = vmatprep.subr.bf16.mxu1 %v1518_v44 }
  0x8b   :  { %1176 = vmatpush3.bf16.msra.mxu0 %v1335_v50 }
  0x8c   :  { %1177 = vmatprep.subr.bf16.mxu0 %v1336_v51 }
  0x8d   :  { %1229 = vmatpush3.bf16.msra.mxu1 %v1345_v2 }
  0x8e   :  { %1230 = vmatprep.subr.bf16.mxu1 %v1518_v44 }
  0x8f   :  { %1178 = vmatpush3.bf16.msra.mxu0 %v1337_v52 }
  0x90   :  { %1179 = vmatprep.subr.bf16.mxu0 %v1338_v55 }
  0x91   :  { %1231 = vmatpush3.bf16.msra.mxu1 %v1346_v3  ;;  %v1114_v3 = vld [vmem:[%s1708_s8] ss:$0 sm:$0xff] }
  0x92   :  { %1232 = vmatprep.subr.bf16.mxu1 %v1518_v44 }
  0x93   :  { %1180 = vmatpush3.bf16.msra.mxu0 %v1339_v59  ;;  %v1105_v59 = vld [vmem:[%s1706_s6] ss:$0 sm:$0xff]  ;;  %s1520_s6 = smov [#allocation11]  }
  0x94   :  { %1181 = vmatprep.subr.bf16.mxu0 %v1340_v60  ;;  %s1034_s11 = sshll.u32 %s1520_s6, 4  ;;  %s1035_s11 = int_to_ptr.vmem [resolvable:$true] %s1034_s11 }
  0x95   :  { %1233 = vmatpush3.bf16.msra.mxu1 %v1347_v4  ;;  %s1481_s8 = scalar_lea.vmem %s1035_s11, 128  ;;  %p1486_p13 = scmp.lt.s32.totalorder %s1035_s11, %s1035_s11 }
  0x96   :  { %1234 = vmatprep.subr.bf16.mxu1 %v1518_v44  ;;  %p1482_p12 = scmp.ne.s32.totalorder %s1035_s11, %s1481_s8  ;;  %p1487_p0 = scmp.lt.s32.totalorder %s1481_s8, %s1481_s8 }
  0x97   :  { %1182 = vmatpush3.bf16.msra.mxu0 %v1341_v61 }
  0x98   :  { %1244 = vmatprep.subr.bf16.mxu0 %v1518_v44  ;;  %p1488_p1 = por %p1487_p0, %p1486_p13 }
  0x99   :  { %1235 = vmatpush3.bf16.msra.mxu1 %v1348_v5 }
  0x9a   :  { %630 = vmatmul.mubr.bf16.vlgmr.msra.gmra.mrb[4].mxu0 %v111_v63  ;;  %1236 = vmatprep.subr.bf16.mxu1 %v1518_v44  ;;  %p1489_p2 = pnand %p1488_p1, %p1482_p12 }
  0x9b   :  { %1260 = vmatprep.mubr.msk.bf16.mxu0 %vm1519_vm0, %v1518_v44  ;;  %1245 = vmatpush3.bf16.msra.mxu0 %v1351_v8 }
  0x9c   :  { %1246 = vmatprep.subr.bf16.mxu0 %v1518_v44 }
  0x9d   :  { %1237 = vmatpush3.bf16.msra.mxu1 %v1349_v6 }
  0x9e   :  { %1238 = vmatprep.subr.bf16.mxu1 %v1518_v44 }
  0x9f   :  { %1247 = vmatpush3.bf16.msra.mxu0 %v1352_v9 }
  0xa0   :  { %1248 = vmatprep.subr.bf16.mxu0 %v1518_v44 }
  0xa1   :  { %1239 = vmatpush3.bf16.msra.mxu1 %v1350_v7 }
  0xa2   :  { %1264 = vmatprep.subr.bf16.mxu1 %v1518_v44 }
  0xa3   :  { %1249 = vmatpush3.bf16.msra.mxu0 %v1353_v10 }
  0xa4   :  { %1250 = vmatprep.subr.bf16.mxu0 %v1518_v44 }
  0xa7   :  { %1251 = vmatpush3.bf16.msra.mxu0 %v1354_v11 }
  0xa8   :  { %1252 = vmatprep.subr.bf16.mxu0 %v1518_v44 }
  0xab   :  { %1253 = vmatpush3.bf16.msra.mxu0 %v1355_v12 }
  0xac   :  { %1254 = vmatprep.subr.bf16.mxu0 %v1518_v44 }
  0xaf   :  { %1255 = vmatpush3.bf16.msra.mxu0 %v1356_v13 }
  0xb0   :  { %1256 = vmatprep.subr.bf16.mxu0 %v1518_v44 }
  0xb3   :  { %1257 = vmatpush3.bf16.msra.mxu0 %v1357_v40 }
  0xb4   :  { %1258 = vmatprep.subr.bf16.mxu0 %v1518_v44 }
  0xb7   :  { %1259 = vmatpush3.bf16.msra.mxu0 %v1358_v41 }
 0x14d   :  { %v1139_v14 = vpop.f32.mrb[0].mxu0 }
 0x14e   :  { %v1140_v16 = vpop.f32.mrb[1].mxu0 }
 0x14f   :  { %v1141_v17 = vadd.f32 %v1140_v16, %v1139_v14  ;;  %v1142_v18 = vpop.f32.mrb[2].mxu0  ;;  %v1161_v19 = vpop.f32.mrb[0].mxu1 }
 0x150   :  { %v1143_v20 = vpop.f32.mrb[3].mxu0  ;;  %v1162_v22 = vpop.f32.mrb[1].mxu1 }
 0x151   :  { %v552_v21 = vadd.f32 %v1141_v17, %v1045_v15  ;;  %v1163_v23 = vadd.f32 %v1162_v22, %v1161_v19  ;;  %v1164_v24 = vpop.f32.mrb[2].mxu1 }
 0x152   :  { %v1165_v25 = vpop.f32.mrb[3].mxu1 }
 0x153   :  { %v592_v26 = vadd.f32 %v1163_v23, %v552_v21 }
 0x157   :  { %v671_v27 = vpop.f32.mrb[4].mxu1 }
 0x158   :  { %v1222_v28 = vpop.f32.mrb[5].mxu1 }
 0x159   :  { %v674_v29 = vpop.f32.mrb[6].mxu1 }
 0x15a   :  { %v1223_v30 = vpop.f32.mrb[7].mxu1 }
 0x16d   :  { %v1183_v31 = vpop.f32.mrb[4].mxu0 }
 0x16e   :  { %v1184_v32 = vpop.f32.mrb[5].mxu0 }
 0x16f   :  { %v1185_v33 = vadd.f32 %v1184_v32, %v1183_v31  ;;  %v1186_v34 = vpop.f32.mrb[6].mxu0 }
 0x170   :  { %v1187_v35 = vpop.f32.mrb[7].mxu0 }
 0x171   :  { %v632_v36 = vadd.f32 %v1185_v33, %v592_v26 }
 0x173   :  { %v672_v37 = vadd.f32 %v671_v27, %v632_v36 }
 0x175   :  { %v677_v38 = vmax.f32 %v672_v37, 0.0 }
 0x177   :  { %v678_v39 = vpack.c.bf16 %v677_v38, %v677_v38 }
 0x179   :  { %1241 = vmatmul.mubr.bf16.vlgmr.msra.gmra.mrb[8].mxu1 %v678_v39 }
 0x17a   :  { %1280 = vmatprep.mubr.msk.bf16.mxu1 %vm1519_vm0, %v1518_v44  ;;  %1265 = vmatpush3.bf16.msra.mxu1 %v1359_v42 }
 0x17b   :  { %1266 = vmatprep.subr.bf16.mxu1 %v1518_v44 }
 0x17e   :  { %1267 = vmatpush3.bf16.msra.mxu1 %v1360_v43 }
 0x17f   :  { %1268 = vmatprep.subr.bf16.mxu1 %v1518_v44 }
 0x182   :  { %1269 = vmatpush3.bf16.msra.mxu1 %v1361_v45 }
 0x183   :  { %1270 = vmatprep.subr.bf16.mxu1 %v1518_v44 }
 0x186   :  { %1271 = vmatpush3.bf16.msra.mxu1 %v1362_v46 }
 0x187   :  { %1272 = vmatprep.subr.bf16.mxu1 %v1518_v44 }
 0x18a   :  { %1273 = vmatpush3.bf16.msra.mxu1 %v1363_v47 }
 0x18b   :  { %1274 = vmatprep.subr.bf16.mxu1 %v1518_v44 }
 0x18e   :  { %1275 = vmatpush3.bf16.msra.mxu1 %v1364_v48 }
 0x18f   :  { %1276 = vmatprep.subr.bf16.mxu1 %v1518_v44 }
 0x192   :  { %1277 = vmatpush3.bf16.msra.mxu1 %v1365_v57 }
 0x193   :  { %1278 = vmatprep.subr.bf16.mxu1 %v1518_v44 }
 0x196   :  { %1279 = vmatpush3.bf16.msra.mxu1 %v1366_v58 }
 0x24c   :  { %v784_v50 = vpop.f32.mrb[8].mxu1 }
 0x24d   :  { %v785_v51 = vadd.f32 %v1096_v49, %v784_v50  ;;  %v1242_v52 = vpop.f32.mrb[9].mxu1 }
 0x24e   :  { %v787_v53 = vpop.f32.mrb[10].mxu1 }
 0x24f   :  { %v790_v54 = vmax.f32 %v785_v51, 0.0  ;;  %v1243_v55 = vpop.f32.mrb[11].mxu1 }
 0x251   :  { %v791_v56 = vpack.c.bf16 %v790_v54, %v790_v54 }
 0x253   :  { %1261 = vmatmul.mubr.bf16.vlgmr.msra.gmra.mrb[8].mxu0 %v791_v56 }
 0x326   :  { %v897_v60 = vpop.f32.mrb[8].mxu0 }
 0x327   :  { %v898_v61 = vadd.f32 %v1105_v59, %v897_v60  ;;  %v1262_v62 = vpop.f32.mrb[9].mxu0 }
 0x328   :  { %v900_v63 = vpop.f32.mrb[10].mxu0 }
 0x329   :  { %v903_v0 = vmax.f32 %v898_v61, 0.0  ;;  %v1263_v1 = vpop.f32.mrb[11].mxu0 }
 0x32b   :  { %v904_v2 = vpack.c.bf16 %v903_v0, %v903_v0 }
 0x32d   :  { %1281 = vmatmul.mubr.bf16.vlgmr.msra.gmra.mrb[12].mxu1 %v904_v2 }
 0x400   :  { %v1010_v4 = vpop.f32.mrb[12].mxu1 }
 0x401   :  { %v1011_v44 = vadd.f32 %v1114_v3, %v1010_v4  ;;  %v1282_v5 = vpop.f32.mrb[13].mxu1 }
 0x402   :  { %v1013_v6 = vpop.f32.mrb[14].mxu1 }
 0x403   :  { %1016 = vmax.xlane.f32.xlu0 %v1011_v44  ;;  %v1283_v7 = vpop.f32.mrb[15].mxu1 }
 0x490   :  { %v1017_v8 = vpop.xlane.xlu0 %1016 }
 0x491   :  { %v1018_v9 = vsub.f32 %v1011_v44, %v1017_v8 }
 0x493   :  { %v1019_v10 = vmul.f32 1.442695, %v1018_v9 }
 0x495   :  { %1367 = vpow2.f32 %v1019_v10 }
 0x49f   :  { %v1368_v11 = vpop.eup %1367 }
 0x4a0   :  { %1021 = vadd.xlane.f32.xlu0 %v1368_v11 }
 0x52d   :  { %v1022_v12 = vpop.xlane.xlu0 %1021 }
 0x52e   :  { %1369 = vlog2.f32 %v1022_v12 }
 0x538   :  { %v1370_v13 = vpop.eup %1369 }
 0x539   :  { %v1024_v14 = vmul.f32 0.6931472, %v1370_v13 }
 0x53b   :  { %v1025_v15 = vsub.f32 %v1018_v9, %v1024_v14 }
 0x53d   :  { %1027 = vst.msk [vmem:[#allocation11] sm:$0xff] %vm1026_vm2, %v1025_v15 }
 0x53e   :  { %1492 = shalt.err (!%p1489_p2)
}
 0x53f   :  { %s1493_s1 = scalar_lea.hbm %s1709_s9, 128 }
 0x540   :  { %p1494_p3 = scmp.ne.s32.totalorder %s1709_s9, %s1493_s1  ;;  %p1497_p4 = scmp.lt.u32.totalorder %s1493_s1, %s1709_s9 }
 0x542   :  { %p1499_p5 = pnand %p1497_p4, %p1494_p3 }
 0x544   :  { %1502 = shalt.err (!%p1499_p5)
}
 0x545   :  { %1037 = dma.vmem_to_hbm [thread:$0]  %s1035_s11, 128, %s1709_s9, [#allocation4]  }
 0x546   :  { %1509 = dma.done.wait [#allocation4], 128  }
 0x547   :  { %1510 = vsyncadd [#allocation4], 4294967168 }
 0x548   :  { %1041 = vsyncpa [#allocation3], 1 }
 0x549   :  { %1042 = vsyncpa [#allocation6], 1 }
 0x54a   :  { %1043 = vsyncpa [#allocation9], 1 }
 0x54b   :  { %1044 = vsyncpa [#allocation4], 1 }

</bundles_post_ra>
